<compile_context>
chip_gen: v7x
topology: tpu7x:2x2x1
jax: 0.10.0
libtpu: 0.0.40
codegen_flags: <defaults>
</compile_context>

<pallas_src>
import functools

import jax
import jax.numpy as jnp
from jax.experimental import pallas as pl
from jax.experimental.pallas import tpu as pltpu

LN_EPS = 1e-5


def _vmem_capacity_bytes():
    """Physical VMEM per core; conservative fallback (v7x = 64 MiB) if unavailable."""
    try:
        return int(pltpu.get_tpu_info().vmem_capacity_bytes)
    except Exception:
        return 64 << 20


def _pick_tile(total, cap, ok):
    """Largest divisor t of `total` with t <= cap and ok(t); falls back to `total`."""
    for t in range(max(1, min(total, cap)), 0, -1):
        if total % t == 0 and ok(t):
            return t
    return total


def _adaptive_query_kernel(x_ref, w1_ref, b1_ref, g_ref, beta_ref,
                           w2_ref, b2_ref, qe_ref, out_ref, *scratch,
                           tq, hidden, flatten, qe_resident, carry):
    def _adaptation():
        x = x_ref[...]                                                     # [tb, H]
        h = jnp.dot(x, w1_ref[...], preferred_element_type=jnp.float32) + b1_ref[...]
        mean = jnp.mean(h, axis=-1, keepdims=True)
        c = h - mean
        var = jnp.mean(c * c, axis=-1, keepdims=True)
        hn = c * jax.lax.rsqrt(var + LN_EPS) * g_ref[...] + beta_ref[...]
        hr = jnp.maximum(hn, 0.0)
        adapt = jnp.dot(hr, w2_ref[...], preferred_element_type=jnp.float32) + b2_ref[...]
        if flatten:
            # Hoisted lane-axis replication: identical for every Q tile of this batch
            # tile, so it is computed once (and carried in scratch when carry=True).
            return jnp.tile(adapt, (1, tq))                                # [tb, tq*H]
        return adapt                                                       # [tb, H]

    if carry:
        # Q axis is innermost & sequential ("arbitrary"): compute once per batch tile,
        # keep resident in VMEM scratch across the pipelined Q tiles.
        adapt_ref = scratch[0]

        @pl.when(pl.program_id(1) == 0)
        def _():
            adapt_ref[...] = _adaptation()

        adapt = adapt_ref[...]
    else:
        # Grid steps are independent (both axes "parallel", usable by a 2nd TC on v7x);
        # the tiny MLP recompute is hidden under the multi-MiB block store.
        adapt = _adaptation()

    j = pl.program_id(1)
    if flatten:
        if qe_resident:
            w = tq * hidden
            qe = qe_ref[:, pl.ds(pl.multiple_of(j * w, w), w)]             # [1, tq*H]
        else:
            qe = qe_ref[...]                                               # [1, tq*H]
        out_ref[...] = (qe + adapt).astype(out_ref.dtype)
    else:
        if qe_resident:
            qe = qe_ref[pl.ds(pl.multiple_of(j * tq, tq), tq), :]          # [tq, H]
        else:
            qe = qe_ref[...]                                               # [tq, H]
        out_ref[...] = (qe[None, :, :] + adapt[:, None, :]).astype(out_ref.dtype)


def adaptive_query_generator(aggregated_features, params, *,
                             out_dtype=jnp.float32,
                             out_block_bytes=4 << 20,
                             max_batch_tile=128):
    """aggregated_features: [B, H] -> [B, Q, H] adaptive queries."""
    x = aggregated_features
    B, H = x.shape
    qe = params["query_embed"]                       # [Q, H]
    Q = qe.shape[0]
    itemsize = jnp.dtype(out_dtype).itemsize
    flatten = (H % 128 != 0)                         # lane-dense slab path for small H

    vmem_cap = _vmem_capacity_bytes()
    budget = int(vmem_cap * 0.7)                     # residency budget (leave headroom)

    # ---- batch tile ---------------------------------------------------------------
    tb = _pick_tile(B, min(B, max_batch_tile), lambda t: t % 8 == 0 or t == B)

    # ---- weight / query_embed residency --------------------------------------------
    weight_bytes = H * H * 4
    # Large H (>= 1024): single-buffer the constant-index weights so 2x double-buffered
    # H*H blocks don't blow v7x's 64 MiB VMEM.
    weight_bufs = 1 if weight_bytes >= (4 << 20) else 2
    qe_bytes = Q * H * 4
    qe_resident = (2 * qe_bytes) <= min(8 << 20, max(1, budget // 4))

    fixed = (2 * weight_bufs * weight_bytes                     # w1 + w2
             + (2 * qe_bytes if qe_resident else 0)             # resident query_embed
             + 2 * tb * H * 4                                   # x block
             + tb * H * 4                                       # adaptation scratch
             + (1 << 20))                                       # biases / LN / slack

    # ---- query tile: fill a multi-MiB lane-dense output block ----------------------
    per_tq = (2 * tb * H * itemsize                             # double-buffered output
              + (tb * H * 4 if flatten else 0)                  # pre-tiled adapt scratch
              + (0 if qe_resident else 2 * H * 4))              # streamed qe block
    tq_cap = min(Q,
                 max(1, out_block_bytes // max(1, tb * H * itemsize)),
                 max(1, (budget - fixed) // max(1, per_tq)))
    if flatten:
        ok = lambda t: (t * H) % 128 == 0 or t == Q
    else:
        ok = lambda t: t % 8 == 0 or t == Q
    tq = _pick_tile(Q, tq_cap, ok)

    nb, nq = B // tb, Q // tq
    carry = (nb > 1) and (nq > 1)
    # carry=False  <=> grid steps independent => both axes parallel (v7x 2nd TC usable).
    dim_sem = ("parallel", "arbitrary") if carry else ("parallel", "parallel")

    # ---- BlockSpecs -----------------------------------------------------------------
    if flatten:
        qe_in = qe.reshape(1, Q * H)                            # free, contiguous
        if qe_resident:
            qe_spec = pl.BlockSpec((1, Q * H), lambda i, j: (0, 0))
        else:
            qe_spec = pl.BlockSpec((1, tq * H), lambda i, j: (0, j))
        out_shape = jax.ShapeDtypeStruct((B, Q * H), out_dtype)
        out_spec = pl.BlockSpec((tb, tq * H), lambda i, j: (i, j))
    else:
        qe_in = qe
        if qe_resident:
            qe_spec = pl.BlockSpec((Q, H), lambda i, j: (0, 0))
        else:
            qe_spec = pl.BlockSpec((tq, H), lambda i, j: (j, 0))
        out_shape = jax.ShapeDtypeStruct((B, Q, H), out_dtype)
        out_spec = pl.BlockSpec((tb, tq, H), lambda i, j: (i, j, 0))

    w_kwargs = {} if weight_bufs == 2 else {"pipeline_mode": pl.Buffered(1)}
    w1_spec = pl.BlockSpec((H, H), lambda i, j: (0, 0), **w_kwargs)
    w2_spec = pl.BlockSpec((H, H), lambda i, j: (0, 0), **w_kwargs)
    vec_spec = pl.BlockSpec((1, H), lambda i, j: (0, 0))

    scratch_shapes = []
    if carry:
        scratch_shapes.append(
            pltpu.VMEM((tb, tq * H) if flatten else (tb, H), jnp.float32))

    footprint = fixed + tq * per_tq
    vmem_limit = int(min(0.85 * vmem_cap, max(32 << 20, footprint + (8 << 20))))

    qe_reads = 1 if qe_resident else nb
    cost = pl.CostEstimate(
        flops=4 * B * H * H + B * Q * H,
        transcendentals=B,
        bytes_accessed=(B * H + 2 * H * H + 4 * H) * 4
                       + qe_reads * Q * H * 4
                       + B * Q * H * itemsize,
    )

    kernel = functools.partial(
        _adaptive_query_kernel,
        tq=tq, hidden=H, flatten=flatten, qe_resident=qe_resident, carry=carry)

    out = pl.pallas_call(
        kernel,
        out_shape=out_shape,
        grid_spec=pltpu.PrefetchScalarGridSpec(
            num_scalar_prefetch=0,
            grid=(nb, nq),
            in_specs=[
                pl.BlockSpec((tb, H), lambda i, j: (i, 0)),     # aggregated_features
                w1_spec,                                        # w1 (VMEM resident)
                vec_spec,                                       # b1
                vec_spec,                                       # ln_gamma
                vec_spec,                                       # ln_beta
                w2_spec,                                        # w2 (VMEM resident)
                vec_spec,                                       # b2
                qe_spec,                                        # query_embed
            ],
            out_specs=out_spec,
            scratch_shapes=scratch_shapes,
        ),
        compiler_params=pltpu.CompilerParams(
            dimension_semantics=dim_sem,
            vmem_limit_bytes=vmem_limit,
        ),
        cost_estimate=cost,
    )(x, params["w1"], params["b1"], params["ln_gamma"], params["ln_beta"],
      params["w2"], params["b2"], qe_in)

    return out.reshape(B, Q, H)


def init_params(key, hidden_dim, num_queries):
    k_qe, k_w1, k_b1, k_w2, k_b2 = jax.random.split(key, 5)
    scale = 1.0 / jnp.sqrt(hidden_dim)
    return {
        # nn.Embedding(num_queries, hidden_dim): N(0,1) init
        "query_embed": jax.random.normal(k_qe, (num_queries, hidden_dim), jnp.float32),
        # Linear weights stored pre-transposed as [in, out] so the kernel does x @ W
        "w1": jax.random.uniform(k_w1, (hidden_dim, hidden_dim), jnp.float32, -scale, scale),
        "b1": jax.random.uniform(k_b1, (1, hidden_dim), jnp.float32, -scale, scale),
        "ln_gamma": jnp.ones((1, hidden_dim), jnp.float32),
        "ln_beta": jnp.zeros((1, hidden_dim), jnp.float32),
        "w2": jax.random.uniform(k_w2, (hidden_dim, hidden_dim), jnp.float32, -scale, scale),
        "b2": jax.random.uniform(k_b2, (1, hidden_dim), jnp.float32, -scale, scale),
    }


def reference_forward(x, p):
    h = x @ p["w1"] + p["b1"]
    mean = h.mean(-1, keepdims=True)
    var = ((h - mean) ** 2).mean(-1, keepdims=True)
    hn = (h - mean) / jnp.sqrt(var + LN_EPS) * p["ln_gamma"] + p["ln_beta"]
    adaptation = jnp.maximum(hn, 0.0) @ p["w2"] + p["b2"]
    return p["query_embed"][None, :, :] + adaptation[:, None, :]


if __name__ == "__main__":
    key = jax.random.PRNGKey(0)

    # Test 1: small shapes (batch=2, hidden=32, queries=8) -> lane-dense flattened
    # output path (H < 128), resident query_embed, single grid step.
    B, H, Q = 2, 32, 8
    k_x, k_p, key = jax.random.split(key, 3)
    x = jax.random.normal(k_x, (B, H), jnp.float32)
    params = init_params(k_p, H, Q)
    out = jax.block_until_ready(adaptive_query_generator(x, params))
    ref = reference_forward(x, params)
    assert out.shape == (B, Q, H), out.shape
    assert jnp.allclose(out, ref, atol=1e-4, rtol=1e-4), "mismatch vs reference (small)"

    # Test 2: lane-dense hidden dim with default (multi-MiB) block budget.
    B2, H2, Q2 = 16, 256, 64
    k_x2, k_p2, key = jax.random.split(key, 3)
    x2 = jax.random.normal(k_x2, (B2, H2), jnp.float32)
    params2 = init_params(k_p2, H2, Q2)
    out2 = jax.block_until_ready(adaptive_query_generator(x2, params2))
    ref2 = reference_forward(x2, params2)
    assert out2.shape == (B2, Q2, H2), out2.shape
    assert jnp.allclose(out2, ref2, atol=2e-3, rtol=2e-3), "mismatch vs reference (big-block)"

    # Test 3: force a (2 x 8) grid to exercise the VMEM adaptation carry, the resident
    # query_embed in-kernel pl.ds slicing and the pipelined Q tiling.
    out3 = jax.block_until_ready(
        adaptive_query_generator(x2, params2, max_batch_tile=8, out_block_bytes=64 << 10))
    assert out3.shape == (B2, Q2, H2), out3.shape
    assert jnp.allclose(out3, ref2, atol=2e-3, rtol=2e-3), "mismatch vs reference (tiled)"

    # Test 4: flattened path with carry (pre-tiled adaptation scratch) and bf16 output.
    B4, H4, Q4 = 16, 32, 64
    k_x4, k_p4, _ = jax.random.split(key, 3)
    x4 = jax.random.normal(k_x4, (B4, H4), jnp.float32)
    params4 = init_params(k_p4, H4, Q4)
    out4 = jax.block_until_ready(
        adaptive_query_generator(x4, params4, out_dtype=jnp.bfloat16,
                                 max_batch_tile=8, out_block_bytes=8 << 10))
    ref4 = reference_forward(x4, params4)
    assert out4.shape == (B4, Q4, H4), out4.shape
    assert jnp.allclose(out4.astype(jnp.float32), ref4, atol=5e-2, rtol=5e-2), \
        "mismatch vs reference (flatten/bf16)"

    print("KERNEL_OK")
</pallas_src>

<mosaic_0001>
module attributes {stable_mosaic.version = 11 : i64} {
  func.func @_adaptive_query_kernel(%arg0: i32, %arg1: i32, %arg2: memref<2x32xf32, #tpu.memory_space<vmem>>, %arg3: memref<32x32xf32, #tpu.memory_space<vmem>>, %arg4: memref<1x32xf32, #tpu.memory_space<vmem>>, %arg5: memref<1x32xf32, #tpu.memory_space<vmem>>, %arg6: memref<1x32xf32, #tpu.memory_space<vmem>>, %arg7: memref<32x32xf32, #tpu.memory_space<vmem>>, %arg8: memref<1x32xf32, #tpu.memory_space<vmem>>, %arg9: memref<1x256xf32, #tpu.memory_space<vmem>>, %arg10: memref<2x256xf32, #tpu.memory_space<vmem>>) attributes {dimension_semantics = [#tpu.dimension_semantics<parallel>, #tpu.dimension_semantics<parallel>], iteration_bounds = array<i64: 1, 1>, scalar_prefetch = 0 : i64, scratch_operands = 0 : i64, tpu.core_type = #tpu.core_type<tc>, window_params = [{transform_indices = @transform_0, window_bounds = array<i64: 2, 32>}, {pipeline_mode = #tpu.pipeline_mode<synchronous>, transform_indices = @transform_1, window_bounds = array<i64: 32, 32>}, {pipeline_mode = #tpu.pipeline_mode<synchronous>, transform_indices = @transform_2, window_bounds = array<i64: 1, 32>}, {pipeline_mode = #tpu.pipeline_mode<synchronous>, transform_indices = @transform_3, window_bounds = array<i64: 1, 32>}, {pipeline_mode = #tpu.pipeline_mode<synchronous>, transform_indices = @transform_4, window_bounds = array<i64: 1, 32>}, {pipeline_mode = #tpu.pipeline_mode<synchronous>, transform_indices = @transform_5, window_bounds = array<i64: 32, 32>}, {pipeline_mode = #tpu.pipeline_mode<synchronous>, transform_indices = @transform_6, window_bounds = array<i64: 1, 32>}, {pipeline_mode = #tpu.pipeline_mode<synchronous>, transform_indices = @transform_7, window_bounds = array<i64: 1, 256>}, {transform_indices = @transform_8, window_bounds = array<i64: 2, 256>}]} {
    %c0 = arith.constant 0 : index
    %c0_0 = arith.constant 0 : index
    %0 = vector.load %arg2[%c0, %c0_0] : memref<2x32xf32, #tpu.memory_space<vmem>>, vector<2x32xf32>
    %c0_1 = arith.constant 0 : index
    %c0_2 = arith.constant 0 : index
    %1 = vector.load %arg3[%c0_1, %c0_2] : memref<32x32xf32, #tpu.memory_space<vmem>>, vector<32x32xf32>
    %cst = arith.constant dense<0.000000e+00> : vector<2x32xf32>
    %2 = tpu.matmul %0, %1, %cst {dimension_numbers = #tpu.dot_dimension_numbers<[1], [0], [0], [1], [0, 0, 1, 1], [], []>} : vector<2x32xf32>, vector<32x32xf32>, vector<2x32xf32> -> vector<2x32xf32>
    %c0_3 = arith.constant 0 : index
    %c0_4 = arith.constant 0 : index
    %3 = vector.load %arg4[%c0_3, %c0_4] : memref<1x32xf32, #tpu.memory_space<vmem>>, vector<1x32xf32>
    %4 = vector.broadcast %3 : vector<1x32xf32> to vector<2x32xf32>
    %5 = arith.addf %2, %4 : vector<2x32xf32>
    %cst_5 = arith.constant dense<0.000000e+00> : vector<2xf32>
    %6 = vector.multi_reduction <add>, %5, %cst_5 [1] : vector<2x32xf32> to vector<2xf32>
    %7 = vector.shape_cast %6 : vector<2xf32> to vector<2x1xf32>
    %cst_6 = arith.constant 3.200000e+01 : f32
    %8 = vector.broadcast %cst_6 : f32 to vector<2x1xf32>
    %9 = arith.divf %7, %8 : vector<2x1xf32>
    %10 = vector.broadcast %9 : vector<2x1xf32> to vector<2x32xf32>
    %11 = arith.subf %5, %10 : vector<2x32xf32>
    %12 = arith.mulf %11, %11 : vector<2x32xf32>
    %cst_7 = arith.constant dense<0.000000e+00> : vector<2xf32>
    %13 = vector.multi_reduction <add>, %12, %cst_7 [1] : vector<2x32xf32> to vector<2xf32>
    %14 = vector.shape_cast %13 : vector<2xf32> to vector<2x1xf32>
    %cst_8 = arith.constant 3.200000e+01 : f32
    %15 = vector.broadcast %cst_8 : f32 to vector<2x1xf32>
    %16 = arith.divf %14, %15 : vector<2x1xf32>
    %cst_9 = arith.constant 9.99999974E-6 : f32
    %17 = vector.broadcast %cst_9 : f32 to vector<2x1xf32>
    %18 = arith.addf %16, %17 : vector<2x1xf32>
    %19 = math.rsqrt %18 : vector<2x1xf32>
    %20 = vector.broadcast %19 : vector<2x1xf32> to vector<2x32xf32>
    %21 = arith.mulf %11, %20 : vector<2x32xf32>
    %c0_10 = arith.constant 0 : index
    %c0_11 = arith.constant 0 : index
    %22 = vector.load %arg5[%c0_10, %c0_11] : memref<1x32xf32, #tpu.memory_space<vmem>>, vector<1x32xf32>
    %23 = vector.broadcast %22 : vector<1x32xf32> to vector<2x32xf32>
    %24 = arith.mulf %21, %23 : vector<2x32xf32>
    %c0_12 = arith.constant 0 : index
    %c0_13 = arith.constant 0 : index
    %25 = vector.load %arg6[%c0_12, %c0_13] : memref<1x32xf32, #tpu.memory_space<vmem>>, vector<1x32xf32>
    %26 = vector.broadcast %25 : vector<1x32xf32> to vector<2x32xf32>
    %27 = arith.addf %24, %26 : vector<2x32xf32>
    %cst_14 = arith.constant 0.000000e+00 : f32
    %28 = vector.broadcast %cst_14 : f32 to vector<2x32xf32>
    %29 = arith.maximumf %27, %28 : vector<2x32xf32>
    %c0_15 = arith.constant 0 : index
    %c0_16 = arith.constant 0 : index
    %30 = vector.load %arg7[%c0_15, %c0_16] : memref<32x32xf32, #tpu.memory_space<vmem>>, vector<32x32xf32>
    %cst_17 = arith.constant dense<0.000000e+00> : vector<2x32xf32>
    %31 = tpu.matmul %29, %30, %cst_17 {dimension_numbers = #tpu.dot_dimension_numbers<[1], [0], [0], [1], [0, 0, 1, 1], [], []>} : vector<2x32xf32>, vector<32x32xf32>, vector<2x32xf32> -> vector<2x32xf32>
    %c0_18 = arith.constant 0 : index
    %c0_19 = arith.constant 0 : index
    %32 = vector.load %arg8[%c0_18, %c0_19] : memref<1x32xf32, #tpu.memory_space<vmem>>, vector<1x32xf32>
    %33 = vector.broadcast %32 : vector<1x32xf32> to vector<2x32xf32>
    %34 = arith.addf %31, %33 : vector<2x32xf32>
    %35 = tpu.concatenate %34, %34, %34, %34, %34, %34, %34, %34 in 1 : vector<2x32xf32>, vector<2x32xf32>, vector<2x32xf32>, vector<2x32xf32>, vector<2x32xf32>, vector<2x32xf32>, vector<2x32xf32>, vector<2x32xf32> -> vector<2x256xf32>
    %c256_i32 = arith.constant 256 : i32
    %36 = arith.muli %arg1, %c256_i32 : i32
    %37 = tpu.assume_multiple %36, 256 : i32
    %c0_20 = arith.constant 0 : index
    %38 = arith.index_cast %37 : i32 to index
    %39 = vector.load %arg9[%c0_20, %38] : memref<1x256xf32, #tpu.memory_space<vmem>>, vector<1x256xf32>
    %40 = vector.broadcast %39 : vector<1x256xf32> to vector<2x256xf32>
    %41 = arith.addf %40, %35 : vector<2x256xf32>
    %c0_21 = arith.constant 0 : index
    %c0_22 = arith.constant 0 : index
    %42 = vector.load %arg10[%c0_21, %c0_22] : memref<2x256xf32, #tpu.memory_space<vmem>>, vector<2x256xf32>
    tpu.vector_store %arg10[%c0_21, %c0_22], %41 {strides = array<i32>} : memref<2x256xf32, #tpu.memory_space<vmem>>, vector<2x256xf32>,
    return
  }
  func.func @transform_0(%arg0: i32, %arg1: i32) -> (i32, i32) {
    %c0_i32 = arith.constant 0 : i32
    %c0_i32_0 = arith.constant 0 : i32
    return %arg0, %c0_i32 : i32, i32
  }
  func.func @transform_1(%arg0: i32, %arg1: i32) -> (i32, i32) {
    %c0_i32 = arith.constant 0 : i32
    %c0_i32_0 = arith.constant 0 : i32
    %c0_i32_1 = arith.constant 0 : i32
    return %c0_i32, %c0_i32_0 : i32, i32
  }
  func.func @transform_2(%arg0: i32, %arg1: i32) -> (i32, i32) {
    %c0_i32 = arith.constant 0 : i32
    %c0_i32_0 = arith.constant 0 : i32
    %c0_i32_1 = arith.constant 0 : i32
    return %c0_i32, %c0_i32_0 : i32, i32
  }
  func.func @transform_3(%arg0: i32, %arg1: i32) -> (i32, i32) {
    %c0_i32 = arith.constant 0 : i32
    %c0_i32_0 = arith.constant 0 : i32
    %c0_i32_1 = arith.constant 0 : i32
    return %c0_i32, %c0_i32_0 : i32, i32
  }
  func.func @transform_4(%arg0: i32, %arg1: i32) -> (i32, i32) {
    %c0_i32 = arith.constant 0 : i32
    %c0_i32_0 = arith.constant 0 : i32
    %c0_i32_1 = arith.constant 0 : i32
    return %c0_i32, %c0_i32_0 : i32, i32
  }
  func.func @transform_5(%arg0: i32, %arg1: i32) -> (i32, i32) {
    %c0_i32 = arith.constant 0 : i32
    %c0_i32_0 = arith.constant 0 : i32
    %c0_i32_1 = arith.constant 0 : i32
    return %c0_i32, %c0_i32_0 : i32, i32
  }
  func.func @transform_6(%arg0: i32, %arg1: i32) -> (i32, i32) {
    %c0_i32 = arith.constant 0 : i32
    %c0_i32_0 = arith.constant 0 : i32
    %c0_i32_1 = arith.constant 0 : i32
    return %c0_i32, %c0_i32_0 : i32, i32
  }
  func.func @transform_7(%arg0: i32, %arg1: i32) -> (i32, i32) {
    %c0_i32 = arith.constant 0 : i32
    %c0_i32_0 = arith.constant 0 : i32
    %c0_i32_1 = arith.constant 0 : i32
    return %c0_i32, %c0_i32_0 : i32, i32
  }
  func.func @transform_8(%arg0: i32, %arg1: i32) -> (i32, i32) {
    %c0_i32 = arith.constant 0 : i32
    return %arg0, %arg1 : i32, i32
  }
}

</mosaic_0001>

<bundles_post_ra>
// kernel: tpu_custom_call.1
= control target key start
LH: loop header
LB: loop body
LE: loop exit
PB: predicated region body
PF: predicated region fallthrough
CT: control target
= control target key end

     0   :  { %13 = vsyncpa [#allocation3], 0  ;;  %s621_s0 = inlined_call_operand.hbm [shape: f32[2,32], index: 0, kind: input, shape index: {}]   ;;  %s622_s1 = inlined_call_operand.hbm [shape: f32[32,32], index: 1, kind: input, shape index: {}]   ;;  %s623_s2 = inlined_call_operand.vmem [shape: f32[1,32], index: 2, kind: input, shape index: {}]   ;;  %s624_s3 = inlined_call_operand.vmem [shape: f32[1,32], index: 3, kind: input, shape index: {}]   ;;  %s625_s4 = inlined_call_operand.vmem [shape: f32[1,32], index: 4, kind: input, shape index: {}]   ;;  %s626_s5 = inlined_call_operand.hbm [shape: f32[32,32], index: 5, kind: input, shape index: {}]   ;;  %s627_s6 = inlined_call_operand.vmem [shape: f32[1,32], index: 6, kind: input, shape index: {}]   ;;  %s628_s7 = inlined_call_operand.vmem [shape: f32[1,256], index: 7, kind: input, shape index: {}]   ;;  %s629_s8 = inlined_call_operand.hbm [shape: f32[2,256], index: 8, kind: output, shape index: {}]  }
   0x1   :  { %14 = vsyncpa [#allocation6], 0 }
   0x2   :  { %15 = vsyncpa [#allocation4], 0  ;;  %s492_s27 = smov [#allocation5]   ;;  %s398_s9 = scalar_lea.hbm %s622_s1, 512 }
   0x3   :  { %s31_s28 = sshll.u32 %s492_s27, 4  ;;  %p399_p0 = scmp.ne.s32.totalorder %s622_s1, %s398_s9  ;;  %s32_s28 = int_to_ptr.vmem [resolvable:$true] %s31_s28 }
   0x4   :  { %p402_p1 = scmp.lt.u32.totalorder %s398_s9, %s622_s1 }
   0x6   :  { %p404_p2 = pnand %p402_p1, %p399_p0 }
   0x8   :  { %407 = shalt.err (!%p404_p2)
}
   0x9   :  { %s408_s14 = scalar_lea.vmem %s32_s28, 512  ;;  %p413_p4 = scmp.lt.s32.totalorder %s32_s28, %s32_s28 }
   0xa   :  { %p409_p3 = scmp.ne.s32.totalorder %s32_s28, %s408_s14  ;;  %p414_p5 = scmp.lt.s32.totalorder %s408_s14, %s408_s14 }
   0xc   :  { %p415_p6 = por %p414_p5, %p413_p4 }
   0xe   :  { %p416_p7 = pnand %p415_p6, %p409_p3 }
  0x10   :  { %419 = shalt.err (!%p416_p7)
}
  0x11   :  { %s493_s15 = smov 128   ;;  %s494_s16 = smov 8  }
  0x12   :  { %37 = dma.hbm_to_vmem [thread:$0]  %s622_s1, 512, %s32_s28, [#allocation6], %s493_s15, %s493_s15, %s494_s16  }
  0x13   :  { %s495_s19 = smov [#allocation2]   ;;  %s496_s21 = smov [#allocation7]  }
  0x14   :  { %s22_s20 = sshll.u32 %s495_s19, 4  ;;  %s49_s22 = sshll.u32 %s496_s21, 4  ;;  %s23_s20 = int_to_ptr.vmem [resolvable:$true] %s22_s20  ;;  %s50_s22 = int_to_ptr.vmem [resolvable:$true] %s49_s22 }
  0x15   :  { %s420_s25 = scalar_lea.hbm %s621_s0, 32 }
  0x16   :  { %p421_p8 = scmp.ne.s32.totalorder %s621_s0, %s420_s25  ;;  %p424_p9 = scmp.lt.u32.totalorder %s420_s25, %s621_s0 }
  0x18   :  { %p426_p10 = pnand %p424_p9, %p421_p8 }
  0x1a   :  { %429 = shalt.err (!%p426_p10)
}
  0x1b   :  { %s430_s1 = scalar_lea.vmem %s23_s20, 32  ;;  %p435_p12 = scmp.lt.s32.totalorder %s23_s20, %s23_s20 }
  0x1c   :  { %p431_p11 = scmp.ne.s32.totalorder %s23_s20, %s430_s1  ;;  %p436_p13 = scmp.lt.s32.totalorder %s430_s1, %s430_s1 }
  0x1e   :  { %p437_p0 = por %p436_p13, %p435_p12 }
  0x20   :  { %p438_p1 = pnand %p437_p0, %p431_p11 }
  0x22   :  { %441 = shalt.err (!%p438_p1)
}
  0x23   :  { %25 = dma.hbm_to_vmem [thread:$0]  %s621_s0, 32, %s23_s20, [#allocation3]  }
  0x24   :  { %s442_s12 = scalar_lea.hbm %s626_s5, 512 }
  0x25   :  { %p443_p2 = scmp.ne.s32.totalorder %s626_s5, %s442_s12  ;;  %p446_p3 = scmp.lt.u32.totalorder %s442_s12, %s626_s5 }
  0x27   :  { %p448_p4 = pnand %p446_p3, %p443_p2 }
  0x29   :  { %451 = shalt.err (!%p448_p4)
}
  0x2a   :  { %s452_s19 = scalar_lea.vmem %s50_s22, 512  ;;  %p457_p6 = scmp.lt.s32.totalorder %s50_s22, %s50_s22 }
  0x2b   :  { %p453_p5 = scmp.ne.s32.totalorder %s50_s22, %s452_s19  ;;  %p458_p7 = scmp.lt.s32.totalorder %s452_s19, %s452_s19 }
  0x2d   :  { %p459_p8 = por %p458_p7, %p457_p6 }
  0x2f   :  { %p460_p9 = pnand %p459_p8, %p453_p5 }
  0x31   :  { %463 = shalt.err (!%p460_p9)
}
  0x32   :  { %55 = dma.hbm_to_vmem [thread:$0]  %s626_s5, 512, %s50_s22, [#allocation6], %s493_s15, %s493_s15, %s494_s16  }
  0x33   :  { %486 = dma.done.wait [#allocation3], 32  }
  0x34   :  { %487 = vsyncadd [#allocation3], 4294967264 }
  0x35   :  { %488 = dma.done.wait [#allocation6], 1024  }
  0x36   :  { %489 = vsyncadd [#allocation6], 4294966272  ;;  %v497_v0 = vmov 0.0|0.0   ;;  %vm498_vm0 = vmmov 0   ;;  %v499_v1 = vmov 0.0   ;;  %v70_v2 = vld [vmem:[#allocation5] sm:$0xff]  ;;  %v292_v39 = vlaneseq }
  0x37   :  { %372 = vmatprep.subr.bf16.mxu0 %v497_v0  ;;  %358 = vmatprep.mubr.msk.f32.mxu0 %vm498_vm0, %v499_v1  ;;  %v71_v3 = vld [vmem:[#allocation5 + $0x8] sm:$0xff]  ;;  %v72_v4 = vld [vmem:[#allocation5 + $0x10] sm:$0xff]  ;;  %v73_v6 = vld [vmem:[#allocation5 + $0x18] sm:$0xff]  ;;  %vm81_vm1 = vcmask 261120   ;;  %vm155_vm2 = vcmask 254976   ;;  %s500_s25 = smov 96  }
  0x38   :  { %378 = vmatprep.subr.bf16.mxu1 %v497_v0  ;;  %369 = vmatprep.mubr.msk.f32.mxu1 %vm498_vm0, %v499_v1  ;;  %v373_v5 = vpack.c.bf16 %v71_v3, %v70_v2  ;;  %v376_v7 = vpack.c.bf16 %v73_v6, %v72_v4  ;;  %v69_v8 = vld [vmem:[#allocation2] sm:$0x3]  ;;  %v187_v19 = vld [vmem:[#allocation7] sm:$0xff]  ;;  %v188_v20 = vld [vmem:[#allocation7 + $0x8] sm:$0xff]  ;;  %s502_s26 = smov 64   ;;  %v293_v40 = vshrl.u32 %v292_v39, 7 }
  0x39   :  { %v333_v9 = vld [vmem:[%s623_s2] ss:$0 sm:$0xff]  ;;  %v189_v21 = vld [vmem:[#allocation7 + $0x10] sm:$0xff]  ;;  %v379_v22 = vpack.c.bf16 %v188_v20, %v187_v19  ;;  %vm282_vm3 = vcmask 523264   ;;  %vm284_vm4 = vcmask 785408  }
  0x3a   :  { %374 = vmatpush3.bf16.msra.mxu0 %v373_v5  ;;  %v190_v23 = vld [vmem:[#allocation7 + $0x18] sm:$0xff]  ;;  %v294_v41 = vsub.s32 0, %v293_v40  ;;  %v298_v42 = vsub.s32 1, %v293_v40 }
  0x3b   :  { %375 = vmatprep.subr.bf16.mxu0 %v497_v0  ;;  %380 = vmatpush3.bf16.msra.mxu1 %v379_v22  ;;  %v382_v24 = vpack.c.bf16 %v190_v23, %v189_v21  ;;  %v335_v29 = vld [vmem:[%s624_s3] ss:$0 sm:$0xff]  ;;  %s501_s3 = smov 32  }
  0x3c   :  { %381 = vmatprep.subr.bf16.mxu1 %v497_v0  ;;  %v336_v31 = vld [vmem:[%s625_s4] ss:$0 sm:$0xff] }
  0x3d   :  { %v337_v35 = vld [vmem:[%s627_s6] ss:$0 sm:$0xff]  ;;  %s503_s6 = smov [#allocation8]  }
  0x3e   :  { %377 = vmatpush3.bf16.msra.mxu0 %v376_v7  ;;  %v290_v44 = vld [vmem:[%s628_s7] sm:$0x3]  ;;  %s322_s29 = sshll.u32 %s503_s6, 4  ;;  %s323_s29 = int_to_ptr.vmem [resolvable:$true] %s322_s29 }
  0x3f   :  { %383 = vmatpush3.bf16.msra.mxu1 %v382_v24  ;;  %v295_v45 = vrot.slane %v290_v44, %v294_v41  ;;  %v299_v46 = vrot.slane %v290_v44, %v298_v42  ;;  %s464_s30 = scalar_lea.vmem %s323_s29, 64  ;;  %p469_p11 = scmp.lt.s32.totalorder %s323_s29, %s323_s29 }
  0x40   :  { %p465_p10 = scmp.ne.s32.totalorder %s323_s29, %s464_s30  ;;  %p470_p12 = scmp.lt.s32.totalorder %s464_s30, %s464_s30 }
  0x41   :  { %359 = vmatmul.mubr.msk.f32.vlgmr.msra.gmra.mrb[0].mxu0 %vm81_vm1, %v69_v8 }
  0x42   :  { %p471_p13 = por %p470_p12, %p469_p11 }
  0x44   :  { %p472_p0 = pnand %p471_p13, %p465_p10 }
 0x114   :  { %v151_v10 = vpop.f32.mrb[0].mxu0 }
 0x115   :  { %v152_v11 = vadd.f32 %v333_v9, %v151_v10  ;;  %v360_v12 = vpop.f32.mrb[1].mxu0 }
 0x117   :  { %v156_v13 = vsel %vm155_vm2, %v152_v11, 0.0 }
 0x118   :  { %157 = vadd.xlane.f32.xlu0 %v156_v13 }
 0x1a5   :  { %v158_v14 = vpop.xlane.xlu0 %157 }
 0x1a6   :  { %v160_v15 = vmul.f32 0.03125, %v158_v14 }
 0x1a8   :  { %v161_v16 = vsub.f32 %v152_v11, %v160_v15 }
 0x1aa   :  { %v162_v17 = vmul.f32 %v161_v16, %v161_v16 }
 0x1ac   :  { %v163_v18 = vsel %vm155_vm2, %v162_v17, 0.0 }
 0x1ad   :  { %164 = vadd.xlane.f32.xlu0 %v163_v18 }
 0x23a   :  { %v165_v25 = vpop.xlane.xlu0 %164 }
 0x23b   :  { %v166_v26 = vmul.f32 0.03125, %v165_v25 }
 0x23d   :  { %v167_v27 = vadd.f32 1e-05, %v166_v26 }
 0x23f   :  { %396 = vrsqrt.f32 %v167_v27 }
 0x249   :  { %v397_v28 = vpop.eup %396 }
 0x24a   :  { %v169_v30 = vmul.f32 %v397_v28, %v161_v16 }
 0x24c   :  { %v177_v32 = vmul.f32 %v335_v29, %v169_v30 }
 0x24e   :  { %v185_v33 = vadd.f32 %v336_v31, %v177_v32 }
 0x250   :  { %v186_v34 = vmax.f32 %v185_v33, 0.0 }
 0x252   :  { %370 = vmatmul.mubr.msk.f32.vlgmr.msra.gmra.mrb[0].mxu1 %vm81_vm1, %v186_v34 }
 0x325   :  { %v267_v36 = vpop.f32.mrb[0].mxu1 }
 0x326   :  { %v268_v37 = vadd.f32 %v337_v35, %v267_v36  ;;  %v371_v38 = vpop.f32.mrb[1].mxu1 }
 0x328   :  { %278 = vrot.lane.b32.xlu0 %v268_v37, %s500_s25  ;;  %272 = vrot.lane.b32.xlu1 %v268_v37, %s501_s3 }
 0x32c   :  { %275 = vrot.lane.b32.xlu1 %v268_v37, %s502_s26 }
 0x39a   :  { %v273_v43 = vpop.permute.xlu1 %272  ;;  %v279_v49 = vpop.permute.xlu0 %278 }
 0x39b   :  { %v281_v47 = vsel %vm81_vm1, %v268_v37, %v273_v43 }
 0x39e   :  { %v276_v48 = vpop.permute.xlu1 %275 }
 0x39f   :  { %v283_v50 = vsel %vm282_vm3, %v281_v47, %v276_v48 }
 0x3a0   :  { %v285_v51 = vsel %vm284_vm4, %v283_v50, %v279_v49 }
 0x3a1   :  { %v302_v52 = vadd.f32 %v295_v45, %v285_v51  ;;  %v303_v53 = vadd.f32 %v299_v46, %v285_v51 }
 0x3a3   :  { %v306_v54 = vcombine.low %v302_v52, %v303_v53 }
 0x3a5   :  { %339 = vst.sshfl [vmem:[#allocation8] sm:$0x33 pattern:$0x76325410] %v306_v54 }
 0x3a6   :  { %475 = shalt.err (!%p472_p0)
}
 0x3a7   :  { %s476_s28 = scalar_lea.hbm %s629_s8, 64 }
 0x3a8   :  { %p477_p1 = scmp.ne.s32.totalorder %s629_s8, %s476_s28  ;;  %p480_p2 = scmp.lt.u32.totalorder %s476_s28, %s629_s8 }
 0x3aa   :  { %p482_p3 = pnand %p480_p2, %p477_p1 }
 0x3ac   :  { %485 = shalt.err (!%p482_p3)
}
 0x3ad   :  { %325 = dma.vmem_to_hbm [thread:$0]  %s323_s29, 64, %s629_s8, [#allocation4]  }
 0x3ae   :  { %490 = dma.done.wait [#allocation4], 64  }
 0x3af   :  { %491 = vsyncadd [#allocation4], 4294967232 }
 0x3b0   :  { %329 = vsyncpa [#allocation3], 1 }
 0x3b1   :  { %330 = vsyncpa [#allocation6], 1 }
 0x3b2   :  { %331 = vsyncpa [#allocation4], 1 }

</bundles_post_ra>
